<compile_context>
chip_gen: v7x
topology: tpu7x:2x2x1
jax: 0.10.0
libtpu: 0.0.40
codegen_flags: <defaults>
</compile_context>

<pallas_src>
import functools

import jax
import jax.numpy as jnp
from jax import lax
from jax.experimental import pallas as pl
from jax.experimental.pallas import tpu as pltpu


def _round_up(x, m):
    return (x + m - 1) // m * m


def _dense_kernel(x_ref, w_ref, b_ref, o_ref, acc_ref, *, activation):
    k = pl.program_id(2)

    @pl.when(k == 0)
    def _():
        acc_ref[...] = jnp.zeros_like(acc_ref)

    # (tm, tk) x (tn, tk) contracted on K -> (tm, tn), f32 accumulate on the MXU.
    acc_ref[...] += lax.dot_general(
        x_ref[...],
        w_ref[...],
        dimension_numbers=(((1,), (1,)), ((), ())),
        preferred_element_type=jnp.float32,
    )

    @pl.when(k == pl.num_programs(2) - 1)
    def _():
        acc = acc_ref[...] + b_ref[...]  # broadcast (1, tn) over (tm, tn)
        if activation == "sigmoid":
            # exp and approx reciprocal both run on the EUP slot (free next to MXU/VPU).
            out = pl.reciprocal(1.0 + jnp.exp(-acc), approx=True)
        elif activation == "leakyrelu":
            out = jnp.where(acc >= 0, acc, 0.01 * acc)  # PyTorch LeakyReLU default slope
        elif activation == "tanh":
            out = jnp.tanh(acc)
        else:
            raise ValueError(f"unknown activation {activation!r}")
        o_ref[...] = out.astype(o_ref.dtype)


def dense_forward(x, weight, bias, activation="sigmoid"):
    """Pallas equivalent of Dense.forward: act(x @ weight.T + bias)."""
    if activation not in ("sigmoid", "leakyrelu", "tanh"):
        raise ValueError(f"unknown activation {activation!r}")

    B, K = x.shape
    N, Kw = weight.shape
    assert Kw == K
    out_dtype = x.dtype

    # Tile sizes: multiples of (8, 128), capped so that double-buffered inputs +
    # the f32 accumulator stay well under the scoped VMEM limit on every chip
    # generation (v5e 16 MiB default .. v7x 64 MiB physical).
    tm = min(512, _round_up(B, 8))
    tn = min(1024, _round_up(N, 128))
    tk = min(1024, _round_up(K, 128))

    Mp = _round_up(B, tm)
    Np = _round_up(N, tn)
    Kp = _round_up(K, tk)

    # Zero-pad to tile multiples (zero K-padding keeps the matmul exact; padded
    # rows / columns are sliced off at the end).
    x_p = x if (Mp == B and Kp == K) else jnp.pad(x, ((0, Mp - B), (0, Kp - K)))
    w_p = weight if (Np == N and Kp == K) else jnp.pad(weight, ((0, Np - N), (0, Kp - K)))
    b_p = bias.reshape(1, N)
    if Np != N:
        b_p = jnp.pad(b_p, ((0, 0), (0, Np - N)))

    grid = (Mp // tm, Np // tn, Kp // tk)

    elem = jnp.dtype(x.dtype).itemsize
    cost = pl.CostEstimate(
        flops=2 * B * K * N,
        transcendentals=B * N,
        bytes_accessed=(B * K + N * K + N) * elem + B * N * jnp.dtype(out_dtype).itemsize,
    )

    kernel = functools.partial(_dense_kernel, activation=activation)
    out_padded = pl.pallas_call(
        kernel,
        out_shape=jax.ShapeDtypeStruct((Mp, Np), out_dtype),
        grid_spec=pltpu.PrefetchScalarGridSpec(
            num_scalar_prefetch=0,
            grid=grid,
            in_specs=[
                pl.BlockSpec((tm, tk), lambda i, j, k: (i, k)),   # x tile
                pl.BlockSpec((tn, tk), lambda i, j, k: (j, k)),   # weight tile (out, in)
                pl.BlockSpec((1, tn), lambda i, j, k: (0, j)),    # bias tile
            ],
            out_specs=pl.BlockSpec((tm, tn), lambda i, j, k: (i, j)),
            scratch_shapes=[pltpu.VMEM((tm, tn), jnp.float32)],
        ),
        compiler_params=pltpu.CompilerParams(
            dimension_semantics=("parallel", "parallel", "arbitrary"),
            vmem_limit_bytes=48 * 1024 * 1024,
        ),
        cost_estimate=cost,
    )(x_p, w_p, b_p)

    if Mp == B and Np == N:
        return out_padded
    return out_padded[:B, :N]


if __name__ == "__main__":
    key = jax.random.PRNGKey(0)
    k_x, k_w, k_b = jax.random.split(key, 3)

    batch = 8
    in_features = 32
    out_features = 16

    x = jax.random.normal(k_x, (batch, in_features), dtype=jnp.float32)
    # Deterministic init mimicking nn.Linear's uniform(-1/sqrt(in), 1/sqrt(in)).
    bound = 1.0 / jnp.sqrt(jnp.float32(in_features))
    weight = jax.random.uniform(
        k_w, (out_features, in_features), dtype=jnp.float32, minval=-bound, maxval=bound
    )
    bias = jax.random.uniform(
        k_b, (out_features,), dtype=jnp.float32, minval=-bound, maxval=bound
    )

    out = dense_forward(x, weight, bias, activation="sigmoid")
    out = jax.block_until_ready(out)

    # Reference check in plain JAX (tolerance loosened slightly for the EUP
    # approximate-reciprocal sigmoid denominator).
    ref = jax.nn.sigmoid(x @ weight.T + bias)
    assert out.shape == (batch, out_features)
    assert out.dtype == x.dtype
    assert jnp.allclose(out, ref, atol=2e-3, rtol=2e-3)

    # Also sanity-check the non-EUP activations.
    out_lr = jax.block_until_ready(dense_forward(x, weight, bias, activation="leakyrelu"))
    ref_lr = jax.nn.leaky_relu(x @ weight.T + bias, negative_slope=0.01)
    assert jnp.allclose(out_lr, ref_lr, atol=1e-5, rtol=1e-5)

    out_th = jax.block_until_ready(dense_forward(x, weight, bias, activation="tanh"))
    ref_th = jnp.tanh(x @ weight.T + bias)
    assert jnp.allclose(out_th, ref_th, atol=1e-5, rtol=1e-5)

    print("KERNEL_OK")
</pallas_src>

<mosaic_0001>
module attributes {stable_mosaic.version = 11 : i64} {
  func.func @_dense_kernel(%arg0: i32, %arg1: i32, %arg2: i32, %arg3: memref<8x128xf32, #tpu.memory_space<vmem>>, %arg4: memref<128x128xf32, #tpu.memory_space<vmem>>, %arg5: memref<1x128xf32, #tpu.memory_space<vmem>>, %arg6: memref<8x128xf32, #tpu.memory_space<vmem>>, %arg7: memref<8x128xf32, #tpu.memory_space<vmem>>) attributes {dimension_semantics = [#tpu.dimension_semantics<parallel>, #tpu.dimension_semantics<parallel>, #tpu.dimension_semantics<arbitrary>], iteration_bounds = array<i64: 1, 1, 1>, scalar_prefetch = 0 : i64, scratch_operands = 1 : i64, tpu.core_type = #tpu.core_type<tc>, window_params = [{transform_indices = @transform_0, window_bounds = array<i64: 8, 128>}, {transform_indices = @transform_1, window_bounds = array<i64: 128, 128>}, {transform_indices = @transform_2, window_bounds = array<i64: 1, 128>}, {transform_indices = @transform_3, window_bounds = array<i64: 8, 128>}]} {
    %c0_i32 = arith.constant 0 : i32
    %0 = arith.cmpi eq, %arg2, %c0_i32 : i32
    %1 = arith.extui %0 : i1 to i32
    %c0_i32_0 = arith.constant 0 : i32
    %2 = arith.cmpi ne, %1, %c0_i32_0 : i32
    scf.if %2 {
      %cst_10 = arith.constant 0.000000e+00 : f32
      %12 = vector.broadcast %cst_10 : f32 to vector<8x128xf32>
      %c0_11 = arith.constant 0 : index
      %c0_12 = arith.constant 0 : index
      %13 = vector.load %arg7[%c0_11, %c0_12] : memref<8x128xf32, #tpu.memory_space<vmem>>, vector<8x128xf32>
      tpu.vector_store %arg7[%c0_11, %c0_12], %12 {strides = array<i32>} : memref<8x128xf32, #tpu.memory_space<vmem>>, vector<8x128xf32>,
    } else {
    }
    %c0 = arith.constant 0 : index
    %c0_1 = arith.constant 0 : index
    %3 = vector.load %arg7[%c0, %c0_1] : memref<8x128xf32, #tpu.memory_space<vmem>>, vector<8x128xf32>
    %c0_2 = arith.constant 0 : index
    %c0_3 = arith.constant 0 : index
    %4 = vector.load %arg3[%c0_2, %c0_3] : memref<8x128xf32, #tpu.memory_space<vmem>>, vector<8x128xf32>
    %c0_4 = arith.constant 0 : index
    %c0_5 = arith.constant 0 : index
    %5 = vector.load %arg4[%c0_4, %c0_5] : memref<128x128xf32, #tpu.memory_space<vmem>>, vector<128x128xf32>
    %cst = arith.constant dense<0.000000e+00> : vector<8x128xf32>
    %6 = tpu.matmul %4, %5, %cst {dimension_numbers = #tpu.dot_dimension_numbers<[1], [1], [0], [0], [0, 0, 1, 0], [], []>} : vector<8x128xf32>, vector<128x128xf32>, vector<8x128xf32> -> vector<8x128xf32>
    %7 = arith.addf %3, %6 : vector<8x128xf32>
    %c0_6 = arith.constant 0 : index
    %c0_7 = arith.constant 0 : index
    %8 = vector.load %arg7[%c0_6, %c0_7] : memref<8x128xf32, #tpu.memory_space<vmem>>, vector<8x128xf32>
    tpu.vector_store %arg7[%c0_6, %c0_7], %7 {strides = array<i32>} : memref<8x128xf32, #tpu.memory_space<vmem>>, vector<8x128xf32>,
    %c0_i32_8 = arith.constant 0 : i32
    %9 = arith.cmpi eq, %arg2, %c0_i32_8 : i32
    %10 = arith.extui %9 : i1 to i32
    %c0_i32_9 = arith.constant 0 : i32
    %11 = arith.cmpi ne, %10, %c0_i32_9 : i32
    scf.if %11 {
      %c0_10 = arith.constant 0 : index
      %c0_11 = arith.constant 0 : index
      %12 = vector.load %arg7[%c0_10, %c0_11] : memref<8x128xf32, #tpu.memory_space<vmem>>, vector<8x128xf32>
      %c0_12 = arith.constant 0 : index
      %c0_13 = arith.constant 0 : index
      %13 = vector.load %arg5[%c0_12, %c0_13] : memref<1x128xf32, #tpu.memory_space<vmem>>, vector<1x128xf32>
      %14 = vector.broadcast %13 : vector<1x128xf32> to vector<8x128xf32>
      %15 = arith.addf %12, %14 : vector<8x128xf32>
      %cst_14 = arith.constant 0.000000e+00 : f32
      %16 = vector.broadcast %cst_14 : f32 to vector<8x128xf32>
      %17 = arith.subf %16, %15 : vector<8x128xf32>
      %18 = math.exp %17 : vector<8x128xf32>
      %cst_15 = arith.constant 1.000000e+00 : f32
      %19 = vector.broadcast %cst_15 : f32 to vector<8x128xf32>
      %20 = arith.addf %19, %18 : vector<8x128xf32>
      %21 = tpu.reciprocal %20 {approx = true} : vector<8x128xf32> -> vector<8x128xf32>
      %c0_16 = arith.constant 0 : index
      %c0_17 = arith.constant 0 : index
      %22 = vector.load %arg6[%c0_16, %c0_17] : memref<8x128xf32, #tpu.memory_space<vmem>>, vector<8x128xf32>
      tpu.vector_store %arg6[%c0_16, %c0_17], %21 {strides = array<i32>} : memref<8x128xf32, #tpu.memory_space<vmem>>, vector<8x128xf32>,
    } else {
    }
    return
  }
  func.func @transform_0(%arg0: i32, %arg1: i32, %arg2: i32) -> (i32, i32) {
    %c0_i32 = arith.constant 0 : i32
    return %arg0, %arg2 : i32, i32
  }
  func.func @transform_1(%arg0: i32, %arg1: i32, %arg2: i32) -> (i32, i32) {
    %c0_i32 = arith.constant 0 : i32
    return %arg1, %arg2 : i32, i32
  }
  func.func @transform_2(%arg0: i32, %arg1: i32, %arg2: i32) -> (i32, i32) {
    %c0_i32 = arith.constant 0 : i32
    %c0_i32_0 = arith.constant 0 : i32
    return %c0_i32, %arg1 : i32, i32
  }
  func.func @transform_3(%arg0: i32, %arg1: i32, %arg2: i32) -> (i32, i32) {
    %c0_i32 = arith.constant 0 : i32
    return %arg0, %arg1 : i32, i32
  }
}

</mosaic_0001>

<bundles_post_ra>
// kernel: tpu_custom_call.1
= control target key start
LH: loop header
LB: loop body
LE: loop exit
PB: predicated region body
PF: predicated region fallthrough
CT: control target
= control target key end

     0   :  { %8 = vsyncpa [#allocation4], 0  ;;  %s405_s0 = inlined_call_operand.hbm [shape: f32[8,128], index: 0, kind: input, shape index: {}]   ;;  %s406_s1 = inlined_call_operand.hbm [shape: f32[128,128], index: 1, kind: input, shape index: {}]   ;;  %s407_s2 = inlined_call_operand.vmem [shape: f32[1,128], index: 2, kind: input, shape index: {}]   ;;  %s408_s3 = inlined_call_operand.hbm [shape: f32[8,128], index: 3, kind: output, shape index: {}]  }
   0x1   :  { %9 = vsyncpa [#allocation7], 0 }
   0x2   :  { %10 = vsyncpa [#allocation5], 0  ;;  %s331_s12 = smov [#allocation3]   ;;  %s332_s14 = smov [#allocation6]  }
   0x3   :  { %s17_s13 = sshll.u32 %s331_s12, 4  ;;  %s26_s15 = sshll.u32 %s332_s14, 4  ;;  %s18_s13 = int_to_ptr.vmem [resolvable:$true] %s17_s13  ;;  %s359_s15 = int_to_ptr.vmem [resolvable:$true] %s26_s15 }
   0x4   :  { %s259_s18 = scalar_lea.hbm %s405_s0, 128 }
   0x5   :  { %p260_p0 = scmp.ne.s32.totalorder %s405_s0, %s259_s18  ;;  %p263_p1 = scmp.lt.u32.totalorder %s259_s18, %s405_s0 }
   0x7   :  { %p265_p2 = pnand %p263_p1, %p260_p0 }
   0x9   :  { %268 = shalt.err (!%p265_p2)
}
   0xa   :  { %s269_s23 = scalar_lea.vmem %s18_s13, 128  ;;  %p274_p4 = scmp.lt.s32.totalorder %s18_s13, %s18_s13 }
   0xb   :  { %p270_p3 = scmp.ne.s32.totalorder %s18_s13, %s269_s23  ;;  %p275_p5 = scmp.lt.s32.totalorder %s269_s23, %s269_s23 }
   0xd   :  { %p276_p6 = por %p275_p5, %p274_p4 }
   0xf   :  { %p277_p7 = pnand %p276_p6, %p270_p3 }
  0x11   :  { %280 = shalt.err (!%p277_p7)
}
  0x12   :  { %20 = dma.hbm_to_vmem [thread:$0]  %s405_s0, 128, %s18_s13, [#allocation4]  }
  0x13   :  { %s281_s28 = scalar_lea.hbm %s406_s1, 2048 }
  0x14   :  { %p282_p8 = scmp.ne.s32.totalorder %s406_s1, %s281_s28  ;;  %p285_p9 = scmp.lt.u32.totalorder %s281_s28, %s406_s1 }
  0x16   :  { %p287_p10 = pnand %p285_p9, %p282_p8 }
  0x18   :  { %290 = shalt.err (!%p287_p10)
}
  0x19   :  { %s291_s6 = scalar_lea.vmem %s359_s15, 2048  ;;  %p296_p12 = scmp.lt.s32.totalorder %s359_s15, %s359_s15 }
  0x1a   :  { %p292_p11 = scmp.ne.s32.totalorder %s359_s15, %s291_s6  ;;  %p297_p13 = scmp.lt.s32.totalorder %s291_s6, %s291_s6 }
  0x1c   :  { %p298_p0 = por %p297_p13, %p296_p12 }
  0x1e   :  { %p299_p1 = pnand %p298_p0, %p292_p11 }
  0x20   :  { %302 = shalt.err (!%p299_p1)
}
  0x21   :  { %s333_s0 = smov 128   ;;  %s334_s7 = smov 8  }
  0x22   :  { %32 = dma.hbm_to_vmem [thread:$0]  %s406_s1, 2048, %s359_s15, [#allocation7], %s333_s0, %s333_s0, %s334_s7  }
  0x23   :  { %325 = dma.done.wait [#allocation4], 128  }
  0x24   :  { %326 = vsyncadd [#allocation4], 4294967168 }
  0x25   :  { %327 = dma.done.wait [#allocation7], 2048  }
  0x26   :  { %328 = vsyncadd [#allocation7], 4294965248  ;;  %v335_v0 = vmov 0.0|0.0   ;;  %vm336_vm0 = vmmov 0   ;;  %v337_v1 = vmov 0.0   ;;  %v48_v2 = vld [vmem:[#allocation6] sm:$0xff] }
  0x27   :  { %223 = vmatprep.subr.bf16.mxu0 %v335_v0  ;;  %220 = vmatprep.mubr.msk.f32.mxu0 %vm336_vm0, %v337_v1  ;;  %v49_v3 = vld [vmem:[#allocation6 + $0x8] sm:$0xff]  ;;  %v50_v5 = vld [vmem:[#allocation6 + $0x10] sm:$0xff]  ;;  %v51_v6 = vld [vmem:[#allocation6 + $0x18] sm:$0xff]  ;;  %s338_s11 = smov [#allocation8]  }
  0x28   :  { %v224_v4 = vpack.c.bf16 %v49_v3, %v48_v2  ;;  %v227_v7 = vpack.c.bf16 %v51_v6, %v50_v5  ;;  %v52_v8 = vld [vmem:[#allocation6 + $0x20] sm:$0xff]  ;;  %v53_v9 = vld [vmem:[#allocation6 + $0x28] sm:$0xff]  ;;  %v54_v11 = vld [vmem:[#allocation6 + $0x30] sm:$0xff]  ;;  %s160_s12 = sshll.u32 %s338_s11, 4  ;;  %s161_s12 = int_to_ptr.vmem [resolvable:$true] %s160_s12 }
  0x29   :  { %v230_v10 = vpack.c.bf16 %v53_v9, %v52_v8  ;;  %v55_v12 = vld [vmem:[#allocation6 + $0x38] sm:$0xff]  ;;  %v56_v14 = vld [vmem:[#allocation6 + $0x40] sm:$0xff]  ;;  %v57_v15 = vld [vmem:[#allocation6 + $0x48] sm:$0xff]  ;;  %s303_s13 = scalar_lea.vmem %s161_s12, 128  ;;  %p308_p3 = scmp.lt.s32.totalorder %s161_s12, %s161_s12 }
  0x2a   :  { %225 = vmatpush3.bf16.xpose.msra.mxu0 %v224_v4  ;;  %v233_v13 = vpack.c.bf16 %v55_v12, %v54_v11  ;;  %v236_v16 = vpack.c.bf16 %v57_v15, %v56_v14  ;;  %v58_v17 = vld [vmem:[#allocation6 + $0x50] sm:$0xff]  ;;  %v59_v18 = vld [vmem:[#allocation6 + $0x58] sm:$0xff]  ;;  %v60_v20 = vld [vmem:[#allocation6 + $0x60] sm:$0xff]  ;;  %p304_p2 = scmp.ne.s32.totalorder %s161_s12, %s303_s13  ;;  %p309_p4 = scmp.lt.s32.totalorder %s303_s13, %s303_s13 }
  0x2b   :  { %226 = vmatprep.subr.bf16.mxu0 %v335_v0  ;;  %v239_v19 = vpack.c.bf16 %v59_v18, %v58_v17  ;;  %v61_v21 = vld [vmem:[#allocation6 + $0x68] sm:$0xff]  ;;  %v62_v23 = vld [vmem:[#allocation6 + $0x70] sm:$0xff]  ;;  %v63_v24 = vld [vmem:[#allocation6 + $0x78] sm:$0xff] }
  0x2c   :  { %v242_v22 = vpack.c.bf16 %v61_v21, %v60_v20  ;;  %v245_v25 = vpack.c.bf16 %v63_v24, %v62_v23  ;;  %v47_v26 = vld [vmem:[#allocation3] sm:$0xff]  ;;  %p310_p5 = por %p309_p4, %p308_p3 }
  0x2d   :  { %v170_v27 = vld [vmem:[%s407_s2] ss:$0 sm:$0xff] }
  0x2e   :  { %p311_p6 = pnand %p310_p5, %p304_p2 }
  0x32   :  { %228 = vmatpush3.bf16.xpose.msra.mxu0 %v227_v7 }
  0x33   :  { %229 = vmatprep.subr.bf16.mxu0 %v335_v0 }
  0x3a   :  { %231 = vmatpush3.bf16.xpose.msra.mxu0 %v230_v10 }
  0x3b   :  { %232 = vmatprep.subr.bf16.mxu0 %v335_v0 }
  0x42   :  { %234 = vmatpush3.bf16.xpose.msra.mxu0 %v233_v13 }
  0x43   :  { %235 = vmatprep.subr.bf16.mxu0 %v335_v0 }
  0x4a   :  { %237 = vmatpush3.bf16.xpose.msra.mxu0 %v236_v16 }
  0x4b   :  { %238 = vmatprep.subr.bf16.mxu0 %v335_v0 }
  0x52   :  { %240 = vmatpush3.bf16.xpose.msra.mxu0 %v239_v19 }
  0x53   :  { %241 = vmatprep.subr.bf16.mxu0 %v335_v0 }
  0x5a   :  { %243 = vmatpush3.bf16.xpose.msra.mxu0 %v242_v22 }
  0x5b   :  { %244 = vmatprep.subr.bf16.mxu0 %v335_v0 }
  0x62   :  { %246 = vmatpush3.bf16.xpose.msra.mxu0 %v245_v25 }
  0x69   :  { %221 = vmatmul.mubr.f32.vlgmr.msra.gmra.mrb[0].mxu0 %v47_v26 }
 0x13c   :  { %v130_v28 = vpop.f32.mrb[0].mxu0 }
 0x13d   :  { %v147_v29 = vadd.f32 %v170_v27, %v130_v28  ;;  %v222_v30 = vpop.f32.mrb[1].mxu0 }
 0x13f   :  { %v148_v31 = vsub.f32 0.0, %v147_v29 }
 0x141   :  { %v149_v32 = vmul.f32 1.442695, %v148_v31 }
 0x143   :  { %255 = vpow2.f32 %v149_v32 }
 0x14d   :  { %v256_v33 = vpop.eup %255 }
 0x14e   :  { %v151_v34 = vadd.f32 1.0, %v256_v33 }
 0x150   :  { %257 = vrcp.f32 %v151_v34 }
 0x15a   :  { %v258_v35 = vpop.eup %257 }
 0x15b   :  { %153 = vst [vmem:[#allocation8] sm:$0xff] %v258_v35 }
 0x15c   :  { %314 = shalt.err (!%p311_p6)
}
 0x15d   :  { %s315_s15 = scalar_lea.hbm %s408_s3, 128 }
 0x15e   :  { %p316_p7 = scmp.ne.s32.totalorder %s408_s3, %s315_s15  ;;  %p319_p8 = scmp.lt.u32.totalorder %s315_s15, %s408_s3 }
 0x160   :  { %p321_p9 = pnand %p319_p8, %p316_p7 }
 0x162   :  { %324 = shalt.err (!%p321_p9)
}
 0x163   :  { %163 = dma.vmem_to_hbm [thread:$0]  %s161_s12, 128, %s408_s3, [#allocation5]  }
 0x164   :  { %329 = dma.done.wait [#allocation5], 128  }
 0x165   :  { %330 = vsyncadd [#allocation5], 4294967168 }
 0x166   :  { %167 = vsyncpa [#allocation4], 1 }
 0x167   :  { %168 = vsyncpa [#allocation7], 1 }
 0x168   :  { %169 = vsyncpa [#allocation5], 1 }

</bundles_post_ra>
